<compile_context>
chip_gen: v6e
topology: v6e:2x2x1
jax: 0.10.0
libtpu: 0.0.40
codegen_flags: <defaults>
</compile_context>

<pallas_src>
import functools

import jax
import jax.numpy as jnp
from jax.experimental import pallas as pl
from jax.experimental.pallas import tpu as pltpu

_BN_EPS = 1e-5


# ---------------------------------------------------------------------------
# Fused kernel
# ---------------------------------------------------------------------------
def _make_vae_kernel(layer_dims, n_enc, latent_dim):
    """Build the fused VAE forward kernel for a fixed (static) layer structure.

    layer_dims: tuple of (in_dim, out_dim) per layer in execution order:
        n_enc encoder layers, 1 merged mu/logvar layer, n_dec decoder layers,
        1 final output layer.  All BN already folded into the linears.
    """
    n_layers = len(layer_dims)

    def kernel(x_ref, eps_ref, w_ref, b_ref, out_ref):
        def affine(h, l):
            din, dout = layer_dims[l]
            w = w_ref[l, :din, :dout]          # bf16, resident in VMEM
            b = b_ref[l, :, :dout]             # f32 (1, dout)
            return jnp.dot(h.astype(w.dtype), w,
                           preferred_element_type=jnp.float32) + b

        # ---- encoder: (Linear + folded BN + ReLU) per hidden dim ----------
        h = x_ref[...]                         # bf16 input tile
        for l in range(n_enc):
            h = jnp.maximum(affine(h, l), 0.0)

        # ---- merged fc_mu / fc_logvar projection --------------------------
        ml = affine(h, n_enc)                  # (tb, 2*latent) f32
        mu = ml[:, :latent_dim]
        logvar = ml[:, latent_dim:]

        # ---- reparameterization: z = mu + eps * exp(0.5*logvar) -----------
        z = mu + eps_ref[...].astype(jnp.float32) * jnp.exp(0.5 * logvar)

        # ---- decoder: (Linear + folded BN + ReLU) per layer ---------------
        d = z
        for l in range(n_enc + 1, n_layers - 1):
            d = jnp.maximum(affine(d, l), 0.0)

        # ---- final output linear -------------------------------------------
        recon = affine(d, n_layers - 1)        # (tb, input_dim) f32

        # One lane-dense output slab: [recon | mu | logvar]  (single store
        # stream; split with cheap XLA slices in the wrapper).
        out_ref[...] = jnp.concatenate([recon, ml], axis=-1).astype(out_ref.dtype)

    return kernel


# ---------------------------------------------------------------------------
# Tiling choice
# ---------------------------------------------------------------------------
def _choose_tile(batch, tile_b):
    """Pick a batch tile: multiple of 8, <= tile_b, and aim for >= 2 grid
    steps so v7x's two TensorCores both get work."""
    if batch <= 8:
        return batch                           # single full-extent block
    half = -(-batch // 2)                      # ceil(B/2)
    half = -(-half // 8) * 8                   # round up to sublane multiple
    tb = max(8, min(int(tile_b), half))
    return (tb // 8) * 8


# ---------------------------------------------------------------------------
# Forward wrapper (single pallas_call, batch-tiled 1-D grid)
# ---------------------------------------------------------------------------
@functools.partial(jax.jit, static_argnames=("layer_dims", "tile_b"))
def vae_forward(w_slab, b_slab, x, eps, *, layer_dims, tile_b=512):
    B, input_dim = x.shape
    latent_dim = eps.shape[1]
    n_enc = (len(layer_dims) - 2) // 2
    out_width = input_dim + 2 * latent_dim

    # Halve input HBM traffic; f32 accumulation happens inside the kernel.
    x_b = x.astype(jnp.bfloat16)
    eps_b = eps.astype(jnp.bfloat16)

    tb = _choose_tile(B, tile_b)
    grid = (pl.cdiv(B, tb),)                   # edge block masked by Pallas

    kernel = _make_vae_kernel(layer_dims, n_enc, latent_dim)

    def batch_spec(d):
        return pl.BlockSpec((tb, d), lambda i: (i, 0))

    def resident_spec(a):
        # Whole array, same block every grid step -> stays resident in VMEM.
        return pl.BlockSpec(a.shape, lambda i: (0,) * a.ndim)

    flops = 2 * B * sum(din * dout for din, dout in layer_dims)
    bytes_accessed = (
        x_b.size * 2 + eps_b.size * 2
        + w_slab.size * jnp.dtype(w_slab.dtype).itemsize
        + b_slab.size * 4
        + B * out_width * 4)

    out = pl.pallas_call(
        kernel,
        out_shape=jax.ShapeDtypeStruct((B, out_width), jnp.float32),
        grid=grid,
        in_specs=[batch_spec(input_dim),
                  batch_spec(latent_dim),
                  resident_spec(w_slab),
                  resident_spec(b_slab)],
        out_specs=batch_spec(out_width),
        compiler_params=pltpu.CompilerParams(
            dimension_semantics=("parallel",)),
        cost_estimate=pl.CostEstimate(
            flops=flops,
            transcendentals=B * latent_dim,
            bytes_accessed=bytes_accessed),
    )(x_b, eps_b, w_slab, b_slab)

    recon = out[:, :input_dim]
    mu = out[:, input_dim:input_dim + latent_dim]
    logvar = out[:, input_dim + latent_dim:]
    return recon, mu, logvar


# ---------------------------------------------------------------------------
# Parameter construction (mimics module __init__ shapes) and prep/folding
# ---------------------------------------------------------------------------
def _linear_params(key, in_dim, out_dim):
    kw, kb = jax.random.split(key)
    # PyTorch Linear weight is (out, in); stored transposed as (in, out).
    w = 0.1 * jax.random.normal(kw, (in_dim, out_dim), dtype=jnp.float32)
    b = 0.1 * jax.random.normal(kb, (1, out_dim), dtype=jnp.float32)
    return {"w": w, "b": b}


def _bn_params(dim):
    # Fresh-init BatchNorm1d: gamma=1, beta=0, running_mean=0, running_var=1.
    return {
        "gamma": jnp.ones((1, dim), jnp.float32),
        "beta": jnp.zeros((1, dim), jnp.float32),
        "mean": jnp.zeros((1, dim), jnp.float32),
        "var": jnp.ones((1, dim), jnp.float32),
    }


def init_vae_params(key, input_dim, hidden_dims, latent_dim):
    params = {"encoder": [], "decoder": []}
    prev = input_dim
    for h in hidden_dims:
        key, sub = jax.random.split(key)
        params["encoder"].append({**_linear_params(sub, prev, h),
                                  **_bn_params(h)})
        prev = h
    enc_out = hidden_dims[-1] if hidden_dims else input_dim
    key, k_mu, k_lv = jax.random.split(key, 3)
    params["fc_mu"] = _linear_params(k_mu, enc_out, latent_dim)
    params["fc_logvar"] = _linear_params(k_lv, enc_out, latent_dim)
    dec_dims = [latent_dim] + list(reversed(hidden_dims))
    for i in range(len(dec_dims) - 1):
        key, sub = jax.random.split(key)
        params["decoder"].append(
            {**_linear_params(sub, dec_dims[i], dec_dims[i + 1]),
             **_bn_params(dec_dims[i + 1])})
    key, k_out = jax.random.split(key)
    params["dec_out"] = _linear_params(k_out, dec_dims[-1], input_dim)
    return params


def _fold_linear_bn(layer):
    """Fold eval-mode BatchNorm into the preceding Linear (exact in eval)."""
    s = layer["gamma"] * jax.lax.rsqrt(layer["var"] + _BN_EPS)   # (1, out)
    w = layer["w"] * s
    b = (layer["b"] - layer["mean"]) * s + layer["beta"]
    return w, b


def prepare_vae_params(params, w_dtype=jnp.bfloat16):
    """Fold BN + merge mu/logvar, then pack all layers into two VMEM-resident
    slabs: weights (L, max_in, max_out) bf16 and biases (L, 1, max_out) f32.
    Returns (w_slab, b_slab, layer_dims)."""
    ws, bs = [], []
    for layer in params["encoder"]:
        w, b = _fold_linear_bn(layer)
        ws.append(w)
        bs.append(b)
    # Merge fc_mu / fc_logvar into one (enc_out, 2*latent) projection.
    ws.append(jnp.concatenate([params["fc_mu"]["w"],
                               params["fc_logvar"]["w"]], axis=1))
    bs.append(jnp.concatenate([params["fc_mu"]["b"],
                               params["fc_logvar"]["b"]], axis=1))
    for layer in params["decoder"]:
        w, b = _fold_linear_bn(layer)
        ws.append(w)
        bs.append(b)
    ws.append(params["dec_out"]["w"])
    bs.append(params["dec_out"]["b"])

    layer_dims = tuple((int(w.shape[0]), int(w.shape[1])) for w in ws)
    n_layers = len(ws)
    max_in = max(d[0] for d in layer_dims)
    max_out = max(d[1] for d in layer_dims)

    w_slab = jnp.zeros((n_layers, max_in, max_out), w_dtype)
    b_slab = jnp.zeros((n_layers, 1, max_out), jnp.float32)
    for l, (w, b) in enumerate(zip(ws, bs)):
        w_slab = w_slab.at[l, :w.shape[0], :w.shape[1]].set(w.astype(w_dtype))
        b_slab = b_slab.at[l, :, :b.shape[1]].set(b.astype(jnp.float32))
    return w_slab, b_slab, layer_dims


# ---------------------------------------------------------------------------
# Pure-JAX f32 reference (eval-mode BN, no dropout) for a tolerance check
# ---------------------------------------------------------------------------
def vae_forward_ref(params, x, eps):
    def bn(h, layer):
        s = layer["gamma"] * jax.lax.rsqrt(layer["var"] + _BN_EPS)
        return (h - layer["mean"]) * s + layer["beta"]

    h = x
    for layer in params["encoder"]:
        h = jnp.maximum(bn(h @ layer["w"] + layer["b"], layer), 0.0)
    mu = h @ params["fc_mu"]["w"] + params["fc_mu"]["b"]
    logvar = h @ params["fc_logvar"]["w"] + params["fc_logvar"]["b"]
    z = mu + eps * jnp.exp(0.5 * logvar)
    d = z
    for layer in params["decoder"]:
        d = jnp.maximum(bn(d @ layer["w"] + layer["b"], layer), 0.0)
    recon = d @ params["dec_out"]["w"] + params["dec_out"]["b"]
    return recon, mu, logvar


# ---------------------------------------------------------------------------
# Main
# ---------------------------------------------------------------------------
if __name__ == "__main__":
    batch = 8
    input_dim = 32
    hidden_dims = [64, 32]
    latent_dim = 16

    root = jax.random.PRNGKey(0)
    k_x, k_params, k_eps = jax.random.split(root, 3)

    x = jax.random.normal(k_x, (batch, input_dim), dtype=jnp.float32)
    params = init_vae_params(k_params, input_dim, hidden_dims, latent_dim)
    eps = jax.random.normal(k_eps, (batch, latent_dim), dtype=jnp.float32)

    w_slab, b_slab, layer_dims = prepare_vae_params(params)

    x_recon, mu, logvar = vae_forward(w_slab, b_slab, x, eps,
                                      layer_dims=layer_dims)
    jax.block_until_ready((x_recon, mu, logvar))

    assert x_recon.shape == (batch, input_dim)
    assert mu.shape == (batch, latent_dim)
    assert logvar.shape == (batch, latent_dim)
    assert bool(jnp.all(jnp.isfinite(x_recon)))

    # Tolerance check vs. f32 reference (bf16 weights/inputs in the kernel).
    r_ref, mu_ref, lv_ref = vae_forward_ref(params, x, eps)
    assert bool(jnp.allclose(mu, mu_ref, atol=0.1, rtol=0.1))
    assert bool(jnp.allclose(logvar, lv_ref, atol=0.1, rtol=0.1))
    assert bool(jnp.allclose(x_recon, r_ref, atol=0.1, rtol=0.1))

    print("KERNEL_OK")
</pallas_src>

<mosaic_0001>
module attributes {stable_mosaic.version = 11 : i64} {
  func.func @kernel(%arg0: i32, %arg1: memref<8x32xbf16, #tpu.memory_space<vmem>>, %arg2: memref<8x16xbf16, #tpu.memory_space<vmem>>, %arg3: memref<6x64x64xbf16, #tpu.memory_space<vmem>>, %arg4: memref<6x1x64xf32, #tpu.memory_space<vmem>>, %arg5: memref<8x64xf32, #tpu.memory_space<vmem>>) attributes {dimension_semantics = [#tpu.dimension_semantics<parallel>], iteration_bounds = array<i64: 1>, scalar_prefetch = 0 : i64, scratch_operands = 0 : i64, tpu.core_type = #tpu.core_type<tc>, window_params = [{transform_indices = @transform_0, window_bounds = array<i64: 8, 32>}, {transform_indices = @transform_1, window_bounds = array<i64: 8, 16>}, {pipeline_mode = #tpu.pipeline_mode<synchronous>, transform_indices = @transform_2, window_bounds = array<i64: 6, 64, 64>}, {pipeline_mode = #tpu.pipeline_mode<synchronous>, transform_indices = @transform_3, window_bounds = array<i64: 6, 1, 64>}, {transform_indices = @transform_4, window_bounds = array<i64: 8, 64>}]} {
    %c0 = arith.constant 0 : index
    %c0_0 = arith.constant 0 : index
    %0 = vector.load %arg1[%c0, %c0_0] : memref<8x32xbf16, #tpu.memory_space<vmem>>, vector<8x32xbf16>
    %c0_1 = arith.constant 0 : index
    %c0_2 = arith.constant 0 : index
    %c0_3 = arith.constant 0 : index
    %1 = vector.load %arg3[%c0_1, %c0_2, %c0_3] : memref<6x64x64xbf16, #tpu.memory_space<vmem>>, vector<1x32x64xbf16>
    %2 = vector.shape_cast %1 : vector<1x32x64xbf16> to vector<32x64xbf16>
    %c0_4 = arith.constant 0 : index
    %c0_5 = arith.constant 0 : index
    %c0_6 = arith.constant 0 : index
    %3 = vector.load %arg4[%c0_4, %c0_5, %c0_6] : memref<6x1x64xf32, #tpu.memory_space<vmem>>, vector<1x1x64xf32>
    %4 = vector.shape_cast %3 : vector<1x1x64xf32> to vector<1x64xf32>
    %cst = arith.constant dense<0.000000e+00> : vector<8x64xf32>
    %5 = tpu.matmul %0, %2, %cst {dimension_numbers = #tpu.dot_dimension_numbers<[1], [0], [0], [1], [0, 0, 1, 1], [], []>} : vector<8x32xbf16>, vector<32x64xbf16>, vector<8x64xf32> -> vector<8x64xf32>
    %6 = vector.broadcast %4 : vector<1x64xf32> to vector<8x64xf32>
    %7 = arith.addf %5, %6 : vector<8x64xf32>
    %cst_7 = arith.constant 0.000000e+00 : f32
    %8 = vector.broadcast %cst_7 : f32 to vector<8x64xf32>
    %9 = arith.maximumf %7, %8 : vector<8x64xf32>
    %c1 = arith.constant 1 : index
    %c0_8 = arith.constant 0 : index
    %c0_9 = arith.constant 0 : index
    %10 = vector.load %arg3[%c1, %c0_8, %c0_9] : memref<6x64x64xbf16, #tpu.memory_space<vmem>>, vector<1x64x32xbf16>
    %11 = vector.shape_cast %10 : vector<1x64x32xbf16> to vector<64x32xbf16>
    %c1_10 = arith.constant 1 : index
    %c0_11 = arith.constant 0 : index
    %c0_12 = arith.constant 0 : index
    %12 = vector.load %arg4[%c1_10, %c0_11, %c0_12] : memref<6x1x64xf32, #tpu.memory_space<vmem>>, vector<1x1x32xf32>
    %13 = vector.shape_cast %12 : vector<1x1x32xf32> to vector<1x32xf32>
    %14 = arith.truncf %9 : vector<8x64xf32> to vector<8x64xbf16>
    %cst_13 = arith.constant dense<0.000000e+00> : vector<8x32xf32>
    %15 = tpu.matmul %14, %11, %cst_13 {dimension_numbers = #tpu.dot_dimension_numbers<[1], [0], [0], [1], [0, 0, 1, 1], [], []>} : vector<8x64xbf16>, vector<64x32xbf16>, vector<8x32xf32> -> vector<8x32xf32>
    %16 = vector.broadcast %13 : vector<1x32xf32> to vector<8x32xf32>
    %17 = arith.addf %15, %16 : vector<8x32xf32>
    %cst_14 = arith.constant 0.000000e+00 : f32
    %18 = vector.broadcast %cst_14 : f32 to vector<8x32xf32>
    %19 = arith.maximumf %17, %18 : vector<8x32xf32>
    %c2 = arith.constant 2 : index
    %c0_15 = arith.constant 0 : index
    %c0_16 = arith.constant 0 : index
    %20 = vector.load %arg3[%c2, %c0_15, %c0_16] : memref<6x64x64xbf16, #tpu.memory_space<vmem>>, vector<1x32x32xbf16>
    %21 = vector.shape_cast %20 : vector<1x32x32xbf16> to vector<32x32xbf16>
    %c2_17 = arith.constant 2 : index
    %c0_18 = arith.constant 0 : index
    %c0_19 = arith.constant 0 : index
    %22 = vector.load %arg4[%c2_17, %c0_18, %c0_19] : memref<6x1x64xf32, #tpu.memory_space<vmem>>, vector<1x1x32xf32>
    %23 = vector.shape_cast %22 : vector<1x1x32xf32> to vector<1x32xf32>
    %24 = arith.truncf %19 : vector<8x32xf32> to vector<8x32xbf16>
    %cst_20 = arith.constant dense<0.000000e+00> : vector<8x32xf32>
    %25 = tpu.matmul %24, %21, %cst_20 {dimension_numbers = #tpu.dot_dimension_numbers<[1], [0], [0], [1], [0, 0, 1, 1], [], []>} : vector<8x32xbf16>, vector<32x32xbf16>, vector<8x32xf32> -> vector<8x32xf32>
    %26 = vector.broadcast %23 : vector<1x32xf32> to vector<8x32xf32>
    %27 = arith.addf %25, %26 : vector<8x32xf32>
    %28 = vector.extract_strided_slice %27 {offsets = [0, 0], sizes = [8, 16], strides = [1, 1]} : vector<8x32xf32> to vector<8x16xf32>
    %29 = vector.extract_strided_slice %27 {offsets = [0, 16], sizes = [8, 16], strides = [1, 1]} : vector<8x32xf32> to vector<8x16xf32>
    %c0_21 = arith.constant 0 : index
    %c0_22 = arith.constant 0 : index
    %30 = vector.load %arg2[%c0_21, %c0_22] : memref<8x16xbf16, #tpu.memory_space<vmem>>, vector<8x16xbf16>
    %31 = arith.extf %30 : vector<8x16xbf16> to vector<8x16xf32>
    %cst_23 = arith.constant 5.000000e-01 : f32
    %32 = vector.broadcast %cst_23 : f32 to vector<8x16xf32>
    %33 = arith.mulf %32, %29 : vector<8x16xf32>
    %34 = math.exp %33 : vector<8x16xf32>
    %35 = arith.mulf %31, %34 : vector<8x16xf32>
    %36 = arith.addf %28, %35 : vector<8x16xf32>
    %c3 = arith.constant 3 : index
    %c0_24 = arith.constant 0 : index
    %c0_25 = arith.constant 0 : index
    %37 = vector.load %arg3[%c3, %c0_24, %c0_25] : memref<6x64x64xbf16, #tpu.memory_space<vmem>>, vector<1x16x32xbf16>
    %38 = vector.shape_cast %37 : vector<1x16x32xbf16> to vector<16x32xbf16>
    %c3_26 = arith.constant 3 : index
    %c0_27 = arith.constant 0 : index
    %c0_28 = arith.constant 0 : index
    %39 = vector.load %arg4[%c3_26, %c0_27, %c0_28] : memref<6x1x64xf32, #tpu.memory_space<vmem>>, vector<1x1x32xf32>
    %40 = vector.shape_cast %39 : vector<1x1x32xf32> to vector<1x32xf32>
    %41 = arith.truncf %36 : vector<8x16xf32> to vector<8x16xbf16>
    %cst_29 = arith.constant dense<0.000000e+00> : vector<8x32xf32>
    %42 = tpu.matmul %41, %38, %cst_29 {dimension_numbers = #tpu.dot_dimension_numbers<[1], [0], [0], [1], [0, 0, 1, 1], [], []>} : vector<8x16xbf16>, vector<16x32xbf16>, vector<8x32xf32> -> vector<8x32xf32>
    %43 = vector.broadcast %40 : vector<1x32xf32> to vector<8x32xf32>
    %44 = arith.addf %42, %43 : vector<8x32xf32>
    %cst_30 = arith.constant 0.000000e+00 : f32
    %45 = vector.broadcast %cst_30 : f32 to vector<8x32xf32>
    %46 = arith.maximumf %44, %45 : vector<8x32xf32>
    %c4 = arith.constant 4 : index
    %c0_31 = arith.constant 0 : index
    %c0_32 = arith.constant 0 : index
    %47 = vector.load %arg3[%c4, %c0_31, %c0_32] : memref<6x64x64xbf16, #tpu.memory_space<vmem>>, vector<1x32x64xbf16>
    %48 = vector.shape_cast %47 : vector<1x32x64xbf16> to vector<32x64xbf16>
    %c4_33 = arith.constant 4 : index
    %c0_34 = arith.constant 0 : index
    %c0_35 = arith.constant 0 : index
    %49 = vector.load %arg4[%c4_33, %c0_34, %c0_35] : memref<6x1x64xf32, #tpu.memory_space<vmem>>, vector<1x1x64xf32>
    %50 = vector.shape_cast %49 : vector<1x1x64xf32> to vector<1x64xf32>
    %51 = arith.truncf %46 : vector<8x32xf32> to vector<8x32xbf16>
    %cst_36 = arith.constant dense<0.000000e+00> : vector<8x64xf32>
    %52 = tpu.matmul %51, %48, %cst_36 {dimension_numbers = #tpu.dot_dimension_numbers<[1], [0], [0], [1], [0, 0, 1, 1], [], []>} : vector<8x32xbf16>, vector<32x64xbf16>, vector<8x64xf32> -> vector<8x64xf32>
    %53 = vector.broadcast %50 : vector<1x64xf32> to vector<8x64xf32>
    %54 = arith.addf %52, %53 : vector<8x64xf32>
    %cst_37 = arith.constant 0.000000e+00 : f32
    %55 = vector.broadcast %cst_37 : f32 to vector<8x64xf32>
    %56 = arith.maximumf %54, %55 : vector<8x64xf32>
    %c5 = arith.constant 5 : index
    %c0_38 = arith.constant 0 : index
    %c0_39 = arith.constant 0 : index
    %57 = vector.load %arg3[%c5, %c0_38, %c0_39] : memref<6x64x64xbf16, #tpu.memory_space<vmem>>, vector<1x64x32xbf16>
    %58 = vector.shape_cast %57 : vector<1x64x32xbf16> to vector<64x32xbf16>
    %c5_40 = arith.constant 5 : index
    %c0_41 = arith.constant 0 : index
    %c0_42 = arith.constant 0 : index
    %59 = vector.load %arg4[%c5_40, %c0_41, %c0_42] : memref<6x1x64xf32, #tpu.memory_space<vmem>>, vector<1x1x32xf32>
    %60 = vector.shape_cast %59 : vector<1x1x32xf32> to vector<1x32xf32>
    %61 = arith.truncf %56 : vector<8x64xf32> to vector<8x64xbf16>
    %cst_43 = arith.constant dense<0.000000e+00> : vector<8x32xf32>
    %62 = tpu.matmul %61, %58, %cst_43 {dimension_numbers = #tpu.dot_dimension_numbers<[1], [0], [0], [1], [0, 0, 1, 1], [], []>} : vector<8x64xbf16>, vector<64x32xbf16>, vector<8x32xf32> -> vector<8x32xf32>
    %63 = vector.broadcast %60 : vector<1x32xf32> to vector<8x32xf32>
    %64 = arith.addf %62, %63 : vector<8x32xf32>
    %65 = tpu.concatenate %64, %27 in 1 : vector<8x32xf32>, vector<8x32xf32> -> vector<8x64xf32>
    %c0_44 = arith.constant 0 : index
    %c0_45 = arith.constant 0 : index
    %66 = vector.load %arg5[%c0_44, %c0_45] : memref<8x64xf32, #tpu.memory_space<vmem>>, vector<8x64xf32>
    tpu.vector_store %arg5[%c0_44, %c0_45], %65 {strides = array<i32>} : memref<8x64xf32, #tpu.memory_space<vmem>>, vector<8x64xf32>,
    return
  }
  func.func @transform_0(%arg0: i32) -> (i32, i32) {
    %c0_i32 = arith.constant 0 : i32
    %c0_i32_0 = arith.constant 0 : i32
    return %arg0, %c0_i32 : i32, i32
  }
  func.func @transform_1(%arg0: i32) -> (i32, i32) {
    %c0_i32 = arith.constant 0 : i32
    %c0_i32_0 = arith.constant 0 : i32
    return %arg0, %c0_i32 : i32, i32
  }
  func.func @transform_2(%arg0: i32) -> (i32, i32, i32) {
    %c0_i32 = arith.constant 0 : i32
    %c0_i32_0 = arith.constant 0 : i32
    %c0_i32_1 = arith.constant 0 : i32
    %c0_i32_2 = arith.constant 0 : i32
    return %c0_i32, %c0_i32_0, %c0_i32_1 : i32, i32, i32
  }
  func.func @transform_3(%arg0: i32) -> (i32, i32, i32) {
    %c0_i32 = arith.constant 0 : i32
    %c0_i32_0 = arith.constant 0 : i32
    %c0_i32_1 = arith.constant 0 : i32
    %c0_i32_2 = arith.constant 0 : i32
    return %c0_i32, %c0_i32_0, %c0_i32_1 : i32, i32, i32
  }
  func.func @transform_4(%arg0: i32) -> (i32, i32) {
    %c0_i32 = arith.constant 0 : i32
    %c0_i32_0 = arith.constant 0 : i32
    return %arg0, %c0_i32 : i32, i32
  }
}

</mosaic_0001>

<bundles_post_ra>
// kernel: vae_forward.1
= control target key start
LH: loop header
LB: loop body
LE: loop exit
PB: predicated region body
PF: predicated region fallthrough
CT: control target
= control target key end

     0   :  { %9 = vsyncpa [#allocation3], 0  ;;  %s650_s15 = smov [#allocation2]   ;;  %s746_s0 = inlined_call_operand.vmem [shape: bf16[8,32], index: 0, kind: input, shape index: {}]   ;;  %s747_s1 = inlined_call_operand.vmem [shape: bf16[8,16], index: 1, kind: input, shape index: {}]   ;;  %s748_s2 = inlined_call_operand.hbm [shape: bf16[6,64,64], index: 2, kind: input, shape index: {}]   ;;  %s749_s3 = inlined_call_operand.vmem [shape: f32[6,1,64], index: 3, kind: input, shape index: {}]   ;;  %s750_s4 = inlined_call_operand.vmem [shape: f32[8,64], index: 4, kind: output, shape index: {}]  }
   0x1   :  { %s19_s16 = sshll.u32 %s650_s15, 4  ;;  %s20_s16 = int_to_ptr.vmem [resolvable:$true] %s19_s16 }
   0x2   :  { %s636_s17 = scalar_lea.vmem %s20_s16, 3072  ;;  %p641_p1 = scmp.lt.s32.totalorder %s20_s16, %s20_s16 }
   0x3   :  { %p637_p0 = scmp.ne.s32.totalorder %s20_s16, %s636_s17  ;;  %p642_p2 = scmp.lt.s32.totalorder %s636_s17, %s636_s17 }
   0x5   :  { %p643_p3 = por %p642_p2, %p641_p1 }
   0x7   :  { %p644_p4 = pnand %p643_p3, %p637_p0 }
   0x9   :  { %647 = shalt.err (!%p644_p4)
}
   0xa   :  { %s651_s18 = smov 64   ;;  %s652_s19 = smov 4  }
   0xb   :  { %25 = dma.hbm_to_vmem [thread:$0]  %s748_s2, 3072, %s20_s16, [#allocation3], %s651_s18, %s651_s18, %s652_s19  }
   0xc   :  { %648 = dma.done.wait [#allocation3], 3072  }
   0xd   :  { %649 = vsyncadd [#allocation3], 4294964224  ;;  %v653_v0 = vmov 0.0   ;;  %vm654_vm0 = vmmov 0   ;;  %v611_v1 = vld [vmem:[#allocation2 + $0x8] sm:$0xff]   ;;  %v612_v2 = vld [vmem:[#allocation2] sm:$0xff]  }
   0xe   :  { %550 = vmatprep.subr.bf16.mxu1 %v653_v0  ;;  %554 = vmatprep.mubr.msk.bf16.mxu1 %vm654_vm0, %v653_v0  ;;  %v32_v3 = vld [vmem:[%s746_s0] sm:$0xf]  ;;  %vm56_vm1 = vcmask 261120   ;;  %v613_v4 = vld [vmem:[#allocation2 + $0x38] sm:$0xff]   ;;  %v614_v5 = vld [vmem:[#allocation2 + $0x30] sm:$0xff]   ;;  %vm143_vm2 = vcmask 523264  }
   0xf   :  { %570 = vmatprep.subr.bf16.mxu0 %v653_v0  ;;  %574 = vmatprep.mubr.msk.bf16.mxu0 %vm654_vm0, %v653_v0  ;;  %v615_v6 = vld [vmem:[#allocation2 + $0x28] sm:$0xff]   ;;  %v616_v7 = vld [vmem:[#allocation2 + $0x20] sm:$0xff]   ;;  %s655_s28 = smov 112   ;;  %s656_s29 = smov 32   ;;  %vm286_vm3 = vcmask 130048   ;;  %v622_v44 = vld [vmem:[#allocation2 + $0xb8] sm:$0xff]  }
  0x10   :  { %551 = vmatpush3.bf16.msra.mxu1 %v611_v1  ;;  %v497_v8 = vld [vmem:[%s749_s3] ss:$0 sm:$0xff]  ;;  %v617_v16 = vld [vmem:[#allocation2 + $0x48] sm:$0xff]   ;;  %v502_v18 = vld [vmem:[%s749_s3 + $0x1] ss:$0 sm:$0xff] }
  0x11   :  { %552 = vmatprep.subr.bf16.mxu1 %v653_v0  ;;  %571 = vmatpush3.bf16.msra.mxu0 %v617_v16  ;;  %v618_v17 = vld [vmem:[#allocation2 + $0x40] sm:$0xff]   ;;  %v620_v35 = vld [vmem:[#allocation2 + $0x88] sm:$0xff]   ;;  %v623_v45 = vld [vmem:[#allocation2 + $0xb0] sm:$0xff]  }
  0x12   :  { %572 = vmatprep.subr.bf16.mxu0 %v653_v0  ;;  %v619_v26 = vld [vmem:[#allocation2 + $0x60] sm:$0xff]   ;;  %v624_v54 = vld [vmem:[#allocation2 + $0xa8] sm:$0xff]  }
  0x13   :  { %v509_v27 = vld [vmem:[%s749_s3 + $0x2] ss:$0 sm:$0xff]  ;;  %v514_v46 = vld [vmem:[%s749_s3 + $0x3] ss:$0 sm:$0xff]  ;;  %v518_v56 = vld [vmem:[%s749_s3 + $0x4] ss:$0 sm:$0xff] }
  0x14   :  { %553 = vmatpush3.bf16.msra.mxu1 %v612_v2  ;;  %v257_v37 = vld [vmem:[%s747_s1] sm:$0xf]  ;;  %v523_v1 = vld [vmem:[%s749_s3 + $0x5] ss:$0 sm:$0xff] }
  0x15   :  { %558 = vmatprep.subr.bf16.mxu1 %v653_v0  ;;  %573 = vmatpush3.bf16.msra.mxu0 %v618_v17  ;;  %v258_v38 = vunpack.c.l.bf16 %v257_v37  ;;  %v621_v43 = vld [vmem:[#allocation2 + $0x80] sm:$0xff]  }
  0x16   :  { %578 = vmatprep.subr.bf16.mxu0 %v653_v0  ;;  %v625_v55 = vld [vmem:[#allocation2 + $0xa0] sm:$0xff]  }
  0x17   :  { %555 = vmatmul.mubr.msk.bf16.vlgmr.msra.gmra.mxu1 %vm56_vm1, %v32_v3 }
  0x18   :  { %559 = vmatpush3.bf16.msra.mxu1 %v613_v4  ;;  %566 = vmatprep.mubr.msk.bf16.mxu1 %vm654_vm0, %v653_v0 }
  0x19   :  { %560 = vmatprep.subr.bf16.mxu1 %v653_v0 }
  0x1c   :  { %561 = vmatpush3.bf16.msra.mxu1 %v614_v5 }
  0x1d   :  { %562 = vmatprep.subr.bf16.mxu1 %v653_v0 }
  0x20   :  { %563 = vmatpush3.bf16.msra.mxu1 %v615_v6 }
  0x21   :  { %564 = vmatprep.subr.bf16.mxu1 %v653_v0 }
  0x24   :  { %565 = vmatpush3.bf16.msra.mxu1 %v616_v7 }
  0x25   :  { %584 = vmatprep.subr.bf16.mxu1 %v653_v0 }
  0xd7   :  { %v94_v9 = vpop.f32.mrf.mxu1 }
  0xd8   :  { %v95_v10 = vadd.f32 %v497_v8, %v94_v9 }
  0xd9   :  { %v556_v11 = vpop.f32.mrf.mxu1 }
  0xda   :  { %v100_v12 = vmax.f32 %v95_v10, 0.0 }
  0xdb   :  { %v97_v13 = vpop.f32.mrf.mxu1 }
  0xdc   :  { %v112_v14 = vpack.c.bf16 %v100_v12, %v100_v12 }
  0xdd   :  { %v557_v15 = vpop.f32.mrf.mxu1 }
  0xde   :  { %567 = vmatmul.mubr.msk.bf16.vlgmr.msra.gmra.mxu1 %vm143_vm2, %v112_v14 }
  0xdf   :  { %588 = vmatprep.mubr.msk.bf16.mxu1 %vm654_vm0, %v653_v0  ;;  %585 = vmatpush3.bf16.msra.mxu1 %v620_v35 }
  0xe0   :  { %586 = vmatprep.subr.bf16.mxu1 %v653_v0 }
  0xe3   :  { %587 = vmatpush3.bf16.msra.mxu1 %v621_v43 }
 0x19e   :  { %v181_v19 = vpop.f32.mrf.mxu1 }
 0x19f   :  { %v182_v20 = vadd.f32 %v502_v18, %v181_v19 }
 0x1a0   :  { %v568_v21 = vpop.f32.mrf.mxu1 }
 0x1a1   :  { %v187_v22 = vmax.f32 %v182_v20, 0.0 }
 0x1a2   :  { %v184_v23 = vpop.f32.mrf.mxu1 }
 0x1a3   :  { %v195_v24 = vpack.c.bf16 %v187_v22, %v187_v22 }
 0x1a4   :  { %v569_v25 = vpop.f32.mrf.mxu1 }
 0x1a5   :  { %575 = vmatmul.mubr.msk.bf16.vlgmr.msra.gmra.mxu0 %vm56_vm1, %v195_v24 }
 0x1a6   :  { %580 = vmatprep.mubr.msk.bf16.mxu0 %vm654_vm0, %v653_v0  ;;  %579 = vmatpush3.bf16.msra.mxu0 %v619_v26 }
 0x1a7   :  { %592 = vmatprep.subr.bf16.mxu0 %v653_v0 }
 0x265   :  { %v251_v28 = vpop.f32.mrf.mxu0 }
 0x266   :  { %v252_v29 = vadd.f32 %v509_v27, %v251_v28 }
 0x267   :  { %v576_v30 = vpop.f32.mrf.mxu0 }
 0x268   :  { %v259_v31 = vmul.f32 0.5, %v252_v29 }
 0x269   :  { %v254_v32 = vpop.f32.mrf.mxu0 }
 0x26a   :  { %v260_v33 = vmul.f32 1.442695, %v259_v31 }
 0x26b   :  { %v577_v34 = vpop.f32.mrf.mxu0 }
 0x26c   :  { %626 = vpow2.f32 %v260_v33 }
 0x279   :  { %v627_v36 = vpop.eup %626 }
 0x27a   :  { %263 = vrot.lane.b32.xlu0 %v627_v36, %s655_s28 }
 0x27e   :  { %487 = vrot.lane.b32.xlu0 %v252_v29, %s656_s29 }
 0x2ec   :  { %v264_v39 = vpop.permute.xlu0 %263 }
 0x2ed   :  { %v266_v40 = vmul.f32 %v264_v39, %v258_v38 }
 0x2ef   :  { %v267_v41 = vadd.f32 %v266_v40, %v252_v29 }
 0x2f0   :  { %v488_v3 = vpop.permute.xlu0 %487 }
 0x2f1   :  { %v273_v42 = vpack.c.bf16 %v267_v41, %v267_v41 }
 0x2f3   :  { %581 = vmatmul.mubr.msk.bf16.vlgmr.msra.gmra.mxu0 %vm286_vm3, %v273_v42 }
 0x2f4   :  { %600 = vmatprep.mubr.msk.bf16.mxu0 %vm654_vm0, %v653_v0  ;;  %593 = vmatpush3.bf16.msra.mxu0 %v622_v44 }
 0x2f5   :  { %594 = vmatprep.subr.bf16.mxu0 %v653_v0 }
 0x2f8   :  { %595 = vmatpush3.bf16.msra.mxu0 %v623_v45 }
 0x2f9   :  { %596 = vmatprep.subr.bf16.mxu0 %v653_v0 }
 0x2fc   :  { %597 = vmatpush3.bf16.msra.mxu0 %v624_v54 }
 0x2fd   :  { %598 = vmatprep.subr.bf16.mxu0 %v653_v0 }
 0x300   :  { %599 = vmatpush3.bf16.msra.mxu0 %v625_v55 }
 0x3b3   :  { %v324_v47 = vpop.f32.mrf.mxu0 }
 0x3b4   :  { %v325_v48 = vadd.f32 %v514_v46, %v324_v47 }
 0x3b5   :  { %v582_v49 = vpop.f32.mrf.mxu0 }
 0x3b6   :  { %v330_v50 = vmax.f32 %v325_v48, 0.0 }
 0x3b7   :  { %v327_v51 = vpop.f32.mrf.mxu0 }
 0x3b8   :  { %v338_v52 = vpack.c.bf16 %v330_v50, %v330_v50 }
 0x3b9   :  { %v583_v53 = vpop.f32.mrf.mxu0 }
 0x3ba   :  { %589 = vmatmul.mubr.msk.bf16.vlgmr.msra.gmra.mxu1 %vm56_vm1, %v338_v52 }
 0x47a   :  { %v394_v57 = vpop.f32.mrf.mxu1 }
 0x47b   :  { %v395_v58 = vadd.f32 %v518_v56, %v394_v57 }
 0x47c   :  { %v590_v59 = vpop.f32.mrf.mxu1 }
 0x47d   :  { %v400_v60 = vmax.f32 %v395_v58, 0.0 }
 0x47e   :  { %v397_v61 = vpop.f32.mrf.mxu1 }
 0x47f   :  { %v412_v62 = vpack.c.bf16 %v400_v60, %v400_v60 }
 0x480   :  { %v591_v63 = vpop.f32.mrf.mxu1 }
 0x481   :  { %601 = vmatmul.mubr.msk.bf16.vlgmr.msra.gmra.mxu0 %vm143_vm2, %v412_v62 }
 0x541   :  { %v480_v0 = vpop.f32.mrf.mxu0 }
 0x542   :  { %v481_v2 = vadd.f32 %v523_v1, %v480_v0 }
 0x543   :  { %v602_v4 = vpop.f32.mrf.mxu0 }
 0x544   :  { %v490_v5 = vsel %vm56_vm1, %v481_v2, %v488_v3 }
 0x545   :  { %491 = vst.msk [vmem:[%s750_s4] sm:$0xff] %vm143_vm2, %v490_v5  ;;  %v483_v6 = vpop.f32.mrf.mxu0 }
 0x547   :  { %v603_v7 = vpop.f32.mrf.mxu0 }
 0x548   :  { %496 = vsyncpa [#allocation3], 1 }

</bundles_post_ra>
